<compile_context>
chip_gen: v7x
topology: tpu7x:2x2x1
jax: 0.10.0
libtpu: 0.0.40
codegen_flags: <defaults>
</compile_context>

<pallas_src>
import math

import jax
import jax.numpy as jnp
from jax import lax
from jax.experimental import pallas as pl
from jax.experimental.pallas import tpu as pltpu


def make_fused_mha_kernel(heads, head_dim):
    H, D = heads, head_dim

    def kernel(q_ref, k_ref, v_ref, wq_ref, wk_ref, wv_ref, wo_ref, b_ref, o_ref):
        # Per-batch slabs: (S, E). Weights are already transposed / block-diagonal.
        q_in = q_ref[0]
        k_in = k_ref[0]
        v_in = v_ref[0]

        # Fused per-head projections: (S,E) @ block_diag(W.T) — one lane-dense
        # matmul instead of H tiny (S,D)x(D,D) ones.  The 1/sqrt(E) softmax scale
        # is folded into wq.
        qp = jnp.dot(q_in, wq_ref[...], preferred_element_type=jnp.float32)
        kp = jnp.dot(k_in, wk_ref[...], preferred_element_type=jnp.float32)
        vp = jnp.dot(v_in, wv_ref[...], preferred_element_type=jnp.float32)

        acc = None
        for h in range(H):  # H is small & static: unrolled
            sl = slice(h * D, (h + 1) * D)
            qh = qp[:, sl]
            kh = kp[:, sl]
            vh = vp[:, sl]

            # energy (S_q, S_k): contract the last axes of both operands — the
            # "transpose" is expressed via dimension numbers, not an XLU transpose.
            energy = lax.dot_general(
                qh, kh, (((1,), (1,)), ((), ())),
                preferred_element_type=jnp.float32)

            # softmax over the key axis (scale already applied via wq)
            m = jnp.max(energy, axis=-1, keepdims=True)
            p = jnp.exp(energy - m)
            denom = jnp.sum(p, axis=-1, keepdims=True)
            attn = p * pl.reciprocal(denom, approx=True)

            oh = jnp.dot(attn, vh, preferred_element_type=jnp.float32)  # (S, D)

            # Fused fc_out epilogue:
            #   concat_h(out_h) @ Wo.T == sum_h out_h @ Wo.T[h*D:(h+1)*D, :]
            contrib = jnp.dot(oh, wo_ref[sl, :], preferred_element_type=jnp.float32)
            acc = contrib if acc is None else acc + contrib

        o_ref[0] = (acc + b_ref[...]).astype(o_ref.dtype)  # lane-dense (S, E) store

    return kernel


def multi_head_attention(values, keys, query, params, heads):
    """values/keys/query: (N, S, embed_size) float32. Matches MultiHeadAttention3."""
    N, S, E = query.shape
    D = E // heads
    assert D * heads == E

    scale = 1.0 / math.sqrt(float(E))
    eye_h = jnp.eye(heads, dtype=params["wq"].dtype)

    # Block-diagonal transposed projection weights: applying the same (D,D)
    # nn.Linear to every contiguous head chunk of E == one (E,E) matmul.
    wq_bd = jnp.kron(eye_h, params["wq"].T) * scale   # scale folded into Wq
    wk_bd = jnp.kron(eye_h, params["wk"].T)
    wv_bd = jnp.kron(eye_h, params["wv"].T)
    wo_t = params["w_out"].T                          # (E_in, E_out): no in-kernel .T
    b_out = params["b_out"].reshape(1, E)

    qkv_spec = pl.BlockSpec((1, S, E), lambda n: (n, 0, 0))
    w_spec = pl.BlockSpec((E, E), lambda n: (0, 0))
    b_spec = pl.BlockSpec((1, E), lambda n: (0, 0))

    out = pl.pallas_call(
        make_fused_mha_kernel(heads, D),
        out_shape=jax.ShapeDtypeStruct((N, S, E), jnp.float32),
        grid=(N,),
        in_specs=[qkv_spec, qkv_spec, qkv_spec,
                  w_spec, w_spec, w_spec, w_spec, b_spec],
        out_specs=pl.BlockSpec((1, S, E), lambda n: (n, 0, 0)),
        compiler_params=pltpu.CompilerParams(
            dimension_semantics=("parallel",)),
    )(query, keys, values, wq_bd, wk_bd, wv_bd, wo_t, b_out)

    return out


def reference_mha(values, keys, query, params, heads):
    """Pure-JAX reference matching the PyTorch forward."""
    N, S, E = query.shape
    D = E // heads
    v = values.reshape(N, S, heads, D) @ params["wv"].T
    k = keys.reshape(N, S, heads, D) @ params["wk"].T
    q = query.reshape(N, S, heads, D) @ params["wq"].T
    energy = jnp.einsum("nqhd,nkhd->nhqk", q, k)
    attn = jax.nn.softmax(energy / (E ** 0.5), axis=3)
    out = jnp.einsum("nhql,nlhd->nqhd", attn, v).reshape(N, S, heads * D)
    return out @ params["w_out"].T + params["b_out"]


if __name__ == "__main__":
    N, S, E, H = 2, 8, 32, 4
    D = E // H

    key = jax.random.PRNGKey(0)
    k_in, k_wq, k_wk, k_wv, k_wo, k_bo = jax.random.split(key, 6)
    kq, kk, kv = jax.random.split(k_in, 3)

    query = jax.random.normal(kq, (N, S, E), dtype=jnp.float32)
    keys = jax.random.normal(kk, (N, S, E), dtype=jnp.float32)
    values = jax.random.normal(kv, (N, S, E), dtype=jnp.float32)

    # deterministic synthetic parameters (nn.Linear weight layout: (out, in))
    params = {
        "wq": jax.random.normal(k_wq, (D, D), dtype=jnp.float32) / math.sqrt(D),
        "wk": jax.random.normal(k_wk, (D, D), dtype=jnp.float32) / math.sqrt(D),
        "wv": jax.random.normal(k_wv, (D, D), dtype=jnp.float32) / math.sqrt(D),
        "w_out": jax.random.normal(k_wo, (E, E), dtype=jnp.float32) / math.sqrt(E),
        "b_out": jax.random.normal(k_bo, (E,), dtype=jnp.float32) * 0.01,
    }

    out = multi_head_attention(values, keys, query, params, H)
    out = jax.block_until_ready(out)

    ref = reference_mha(values, keys, query, params, H)
    assert out.shape == (N, S, E)
    # slightly looser tolerance: softmax denom uses the approximate EUP reciprocal
    assert jnp.allclose(out, ref, atol=2e-3, rtol=2e-3), "mismatch vs reference"

    print("KERNEL_OK")
</pallas_src>

<mosaic_0001>
module attributes {stable_mosaic.version = 11 : i64} {
  func.func @kernel(%arg0: i32, %arg1: memref<1x8x32xf32, #tpu.memory_space<vmem>>, %arg2: memref<1x8x32xf32, #tpu.memory_space<vmem>>, %arg3: memref<1x8x32xf32, #tpu.memory_space<vmem>>, %arg4: memref<32x32xf32, #tpu.memory_space<vmem>>, %arg5: memref<32x32xf32, #tpu.memory_space<vmem>>, %arg6: memref<32x32xf32, #tpu.memory_space<vmem>>, %arg7: memref<32x32xf32, #tpu.memory_space<vmem>>, %arg8: memref<1x32xf32, #tpu.memory_space<vmem>>, %arg9: memref<1x8x32xf32, #tpu.memory_space<vmem>>) attributes {dimension_semantics = [#tpu.dimension_semantics<parallel>], iteration_bounds = array<i64: 2>, scalar_prefetch = 0 : i64, scratch_operands = 0 : i64, tpu.core_type = #tpu.core_type<tc>, window_params = [{transform_indices = @transform_0, window_bounds = array<i64: 1, 8, 32>}, {transform_indices = @transform_1, window_bounds = array<i64: 1, 8, 32>}, {transform_indices = @transform_2, window_bounds = array<i64: 1, 8, 32>}, {pipeline_mode = #tpu.pipeline_mode<synchronous>, transform_indices = @transform_3, window_bounds = array<i64: 32, 32>}, {pipeline_mode = #tpu.pipeline_mode<synchronous>, transform_indices = @transform_4, window_bounds = array<i64: 32, 32>}, {pipeline_mode = #tpu.pipeline_mode<synchronous>, transform_indices = @transform_5, window_bounds = array<i64: 32, 32>}, {pipeline_mode = #tpu.pipeline_mode<synchronous>, transform_indices = @transform_6, window_bounds = array<i64: 32, 32>}, {pipeline_mode = #tpu.pipeline_mode<synchronous>, transform_indices = @transform_7, window_bounds = array<i64: 1, 32>}, {transform_indices = @transform_8, window_bounds = array<i64: 1, 8, 32>}]} {
    %c0 = arith.constant 0 : index
    %c0_0 = arith.constant 0 : index
    %c0_1 = arith.constant 0 : index
    %0 = vector.load %arg1[%c0, %c0_0, %c0_1] : memref<1x8x32xf32, #tpu.memory_space<vmem>>, vector<1x8x32xf32>
    %1 = vector.shape_cast %0 : vector<1x8x32xf32> to vector<8x32xf32>
    %c0_2 = arith.constant 0 : index
    %c0_3 = arith.constant 0 : index
    %c0_4 = arith.constant 0 : index
    %2 = vector.load %arg2[%c0_2, %c0_3, %c0_4] : memref<1x8x32xf32, #tpu.memory_space<vmem>>, vector<1x8x32xf32>
    %3 = vector.shape_cast %2 : vector<1x8x32xf32> to vector<8x32xf32>
    %c0_5 = arith.constant 0 : index
    %c0_6 = arith.constant 0 : index
    %c0_7 = arith.constant 0 : index
    %4 = vector.load %arg3[%c0_5, %c0_6, %c0_7] : memref<1x8x32xf32, #tpu.memory_space<vmem>>, vector<1x8x32xf32>
    %5 = vector.shape_cast %4 : vector<1x8x32xf32> to vector<8x32xf32>
    %c0_8 = arith.constant 0 : index
    %c0_9 = arith.constant 0 : index
    %6 = vector.load %arg4[%c0_8, %c0_9] : memref<32x32xf32, #tpu.memory_space<vmem>>, vector<32x32xf32>
    %cst = arith.constant dense<0.000000e+00> : vector<8x32xf32>
    %7 = tpu.matmul %1, %6, %cst {dimension_numbers = #tpu.dot_dimension_numbers<[1], [0], [0], [1], [0, 0, 1, 1], [], []>} : vector<8x32xf32>, vector<32x32xf32>, vector<8x32xf32> -> vector<8x32xf32>
    %c0_10 = arith.constant 0 : index
    %c0_11 = arith.constant 0 : index
    %8 = vector.load %arg5[%c0_10, %c0_11] : memref<32x32xf32, #tpu.memory_space<vmem>>, vector<32x32xf32>
    %cst_12 = arith.constant dense<0.000000e+00> : vector<8x32xf32>
    %9 = tpu.matmul %3, %8, %cst_12 {dimension_numbers = #tpu.dot_dimension_numbers<[1], [0], [0], [1], [0, 0, 1, 1], [], []>} : vector<8x32xf32>, vector<32x32xf32>, vector<8x32xf32> -> vector<8x32xf32>
    %c0_13 = arith.constant 0 : index
    %c0_14 = arith.constant 0 : index
    %10 = vector.load %arg6[%c0_13, %c0_14] : memref<32x32xf32, #tpu.memory_space<vmem>>, vector<32x32xf32>
    %cst_15 = arith.constant dense<0.000000e+00> : vector<8x32xf32>
    %11 = tpu.matmul %5, %10, %cst_15 {dimension_numbers = #tpu.dot_dimension_numbers<[1], [0], [0], [1], [0, 0, 1, 1], [], []>} : vector<8x32xf32>, vector<32x32xf32>, vector<8x32xf32> -> vector<8x32xf32>
    %12 = vector.extract_strided_slice %7 {offsets = [0, 0], sizes = [8, 8], strides = [1, 1]} : vector<8x32xf32> to vector<8x8xf32>
    %13 = vector.extract_strided_slice %9 {offsets = [0, 0], sizes = [8, 8], strides = [1, 1]} : vector<8x32xf32> to vector<8x8xf32>
    %14 = vector.extract_strided_slice %11 {offsets = [0, 0], sizes = [8, 8], strides = [1, 1]} : vector<8x32xf32> to vector<8x8xf32>
    %cst_16 = arith.constant dense<0.000000e+00> : vector<8x8xf32>
    %15 = tpu.matmul %12, %13, %cst_16 {dimension_numbers = #tpu.dot_dimension_numbers<[1], [1], [0], [0], [0, 0, 1, 0], [], []>} : vector<8x8xf32>, vector<8x8xf32>, vector<8x8xf32> -> vector<8x8xf32>
    %cst_17 = arith.constant dense<0xFF800000> : vector<8xf32>
    %16 = vector.multi_reduction <maximumf>, %15, %cst_17 [1] : vector<8x8xf32> to vector<8xf32>
    %17 = vector.shape_cast %16 : vector<8xf32> to vector<8x1xf32>
    %18 = vector.broadcast %17 : vector<8x1xf32> to vector<8x8xf32>
    %19 = arith.subf %15, %18 : vector<8x8xf32>
    %20 = math.exp %19 : vector<8x8xf32>
    %cst_18 = arith.constant dense<0.000000e+00> : vector<8xf32>
    %21 = vector.multi_reduction <add>, %20, %cst_18 [1] : vector<8x8xf32> to vector<8xf32>
    %22 = vector.shape_cast %21 : vector<8xf32> to vector<8x1xf32>
    %23 = tpu.reciprocal %22 {approx = true} : vector<8x1xf32> -> vector<8x1xf32>
    %24 = vector.broadcast %23 : vector<8x1xf32> to vector<8x8xf32>
    %25 = arith.mulf %20, %24 : vector<8x8xf32>
    %cst_19 = arith.constant dense<0.000000e+00> : vector<8x8xf32>
    %26 = tpu.matmul %25, %14, %cst_19 {dimension_numbers = #tpu.dot_dimension_numbers<[1], [0], [0], [1], [0, 0, 1, 1], [], []>} : vector<8x8xf32>, vector<8x8xf32>, vector<8x8xf32> -> vector<8x8xf32>
    %c0_20 = arith.constant 0 : index
    %c0_21 = arith.constant 0 : index
    %27 = vector.load %arg7[%c0_20, %c0_21] : memref<32x32xf32, #tpu.memory_space<vmem>>, vector<8x32xf32>
    %cst_22 = arith.constant dense<0.000000e+00> : vector<8x32xf32>
    %28 = tpu.matmul %26, %27, %cst_22 {dimension_numbers = #tpu.dot_dimension_numbers<[1], [0], [0], [1], [0, 0, 1, 1], [], []>} : vector<8x8xf32>, vector<8x32xf32>, vector<8x32xf32> -> vector<8x32xf32>
    %29 = vector.extract_strided_slice %7 {offsets = [0, 8], sizes = [8, 8], strides = [1, 1]} : vector<8x32xf32> to vector<8x8xf32>
    %30 = vector.extract_strided_slice %9 {offsets = [0, 8], sizes = [8, 8], strides = [1, 1]} : vector<8x32xf32> to vector<8x8xf32>
    %31 = vector.extract_strided_slice %11 {offsets = [0, 8], sizes = [8, 8], strides = [1, 1]} : vector<8x32xf32> to vector<8x8xf32>
    %cst_23 = arith.constant dense<0.000000e+00> : vector<8x8xf32>
    %32 = tpu.matmul %29, %30, %cst_23 {dimension_numbers = #tpu.dot_dimension_numbers<[1], [1], [0], [0], [0, 0, 1, 0], [], []>} : vector<8x8xf32>, vector<8x8xf32>, vector<8x8xf32> -> vector<8x8xf32>
    %cst_24 = arith.constant dense<0xFF800000> : vector<8xf32>
    %33 = vector.multi_reduction <maximumf>, %32, %cst_24 [1] : vector<8x8xf32> to vector<8xf32>
    %34 = vector.shape_cast %33 : vector<8xf32> to vector<8x1xf32>
    %35 = vector.broadcast %34 : vector<8x1xf32> to vector<8x8xf32>
    %36 = arith.subf %32, %35 : vector<8x8xf32>
    %37 = math.exp %36 : vector<8x8xf32>
    %cst_25 = arith.constant dense<0.000000e+00> : vector<8xf32>
    %38 = vector.multi_reduction <add>, %37, %cst_25 [1] : vector<8x8xf32> to vector<8xf32>
    %39 = vector.shape_cast %38 : vector<8xf32> to vector<8x1xf32>
    %40 = tpu.reciprocal %39 {approx = true} : vector<8x1xf32> -> vector<8x1xf32>
    %41 = vector.broadcast %40 : vector<8x1xf32> to vector<8x8xf32>
    %42 = arith.mulf %37, %41 : vector<8x8xf32>
    %cst_26 = arith.constant dense<0.000000e+00> : vector<8x8xf32>
    %43 = tpu.matmul %42, %31, %cst_26 {dimension_numbers = #tpu.dot_dimension_numbers<[1], [0], [0], [1], [0, 0, 1, 1], [], []>} : vector<8x8xf32>, vector<8x8xf32>, vector<8x8xf32> -> vector<8x8xf32>
    %c8 = arith.constant 8 : index
    %c0_27 = arith.constant 0 : index
    %44 = vector.load %arg7[%c8, %c0_27] : memref<32x32xf32, #tpu.memory_space<vmem>>, vector<8x32xf32>
    %cst_28 = arith.constant dense<0.000000e+00> : vector<8x32xf32>
    %45 = tpu.matmul %43, %44, %cst_28 {dimension_numbers = #tpu.dot_dimension_numbers<[1], [0], [0], [1], [0, 0, 1, 1], [], []>} : vector<8x8xf32>, vector<8x32xf32>, vector<8x32xf32> -> vector<8x32xf32>
    %46 = arith.addf %28, %45 : vector<8x32xf32>
    %47 = vector.extract_strided_slice %7 {offsets = [0, 16], sizes = [8, 8], strides = [1, 1]} : vector<8x32xf32> to vector<8x8xf32>
    %48 = vector.extract_strided_slice %9 {offsets = [0, 16], sizes = [8, 8], strides = [1, 1]} : vector<8x32xf32> to vector<8x8xf32>
    %49 = vector.extract_strided_slice %11 {offsets = [0, 16], sizes = [8, 8], strides = [1, 1]} : vector<8x32xf32> to vector<8x8xf32>
    %cst_29 = arith.constant dense<0.000000e+00> : vector<8x8xf32>
    %50 = tpu.matmul %47, %48, %cst_29 {dimension_numbers = #tpu.dot_dimension_numbers<[1], [1], [0], [0], [0, 0, 1, 0], [], []>} : vector<8x8xf32>, vector<8x8xf32>, vector<8x8xf32> -> vector<8x8xf32>
    %cst_30 = arith.constant dense<0xFF800000> : vector<8xf32>
    %51 = vector.multi_reduction <maximumf>, %50, %cst_30 [1] : vector<8x8xf32> to vector<8xf32>
    %52 = vector.shape_cast %51 : vector<8xf32> to vector<8x1xf32>
    %53 = vector.broadcast %52 : vector<8x1xf32> to vector<8x8xf32>
    %54 = arith.subf %50, %53 : vector<8x8xf32>
    %55 = math.exp %54 : vector<8x8xf32>
    %cst_31 = arith.constant dense<0.000000e+00> : vector<8xf32>
    %56 = vector.multi_reduction <add>, %55, %cst_31 [1] : vector<8x8xf32> to vector<8xf32>
    %57 = vector.shape_cast %56 : vector<8xf32> to vector<8x1xf32>
    %58 = tpu.reciprocal %57 {approx = true} : vector<8x1xf32> -> vector<8x1xf32>
    %59 = vector.broadcast %58 : vector<8x1xf32> to vector<8x8xf32>
    %60 = arith.mulf %55, %59 : vector<8x8xf32>
    %cst_32 = arith.constant dense<0.000000e+00> : vector<8x8xf32>
    %61 = tpu.matmul %60, %49, %cst_32 {dimension_numbers = #tpu.dot_dimension_numbers<[1], [0], [0], [1], [0, 0, 1, 1], [], []>} : vector<8x8xf32>, vector<8x8xf32>, vector<8x8xf32> -> vector<8x8xf32>
    %c16 = arith.constant 16 : index
    %c0_33 = arith.constant 0 : index
    %62 = vector.load %arg7[%c16, %c0_33] : memref<32x32xf32, #tpu.memory_space<vmem>>, vector<8x32xf32>
    %cst_34 = arith.constant dense<0.000000e+00> : vector<8x32xf32>
    %63 = tpu.matmul %61, %62, %cst_34 {dimension_numbers = #tpu.dot_dimension_numbers<[1], [0], [0], [1], [0, 0, 1, 1], [], []>} : vector<8x8xf32>, vector<8x32xf32>, vector<8x32xf32> -> vector<8x32xf32>
    %64 = arith.addf %46, %63 : vector<8x32xf32>
    %65 = vector.extract_strided_slice %7 {offsets = [0, 24], sizes = [8, 8], strides = [1, 1]} : vector<8x32xf32> to vector<8x8xf32>
    %66 = vector.extract_strided_slice %9 {offsets = [0, 24], sizes = [8, 8], strides = [1, 1]} : vector<8x32xf32> to vector<8x8xf32>
    %67 = vector.extract_strided_slice %11 {offsets = [0, 24], sizes = [8, 8], strides = [1, 1]} : vector<8x32xf32> to vector<8x8xf32>
    %cst_35 = arith.constant dense<0.000000e+00> : vector<8x8xf32>
    %68 = tpu.matmul %65, %66, %cst_35 {dimension_numbers = #tpu.dot_dimension_numbers<[1], [1], [0], [0], [0, 0, 1, 0], [], []>} : vector<8x8xf32>, vector<8x8xf32>, vector<8x8xf32> -> vector<8x8xf32>
    %cst_36 = arith.constant dense<0xFF800000> : vector<8xf32>
    %69 = vector.multi_reduction <maximumf>, %68, %cst_36 [1] : vector<8x8xf32> to vector<8xf32>
    %70 = vector.shape_cast %69 : vector<8xf32> to vector<8x1xf32>
    %71 = vector.broadcast %70 : vector<8x1xf32> to vector<8x8xf32>
    %72 = arith.subf %68, %71 : vector<8x8xf32>
    %73 = math.exp %72 : vector<8x8xf32>
    %cst_37 = arith.constant dense<0.000000e+00> : vector<8xf32>
    %74 = vector.multi_reduction <add>, %73, %cst_37 [1] : vector<8x8xf32> to vector<8xf32>
    %75 = vector.shape_cast %74 : vector<8xf32> to vector<8x1xf32>
    %76 = tpu.reciprocal %75 {approx = true} : vector<8x1xf32> -> vector<8x1xf32>
    %77 = vector.broadcast %76 : vector<8x1xf32> to vector<8x8xf32>
    %78 = arith.mulf %73, %77 : vector<8x8xf32>
    %cst_38 = arith.constant dense<0.000000e+00> : vector<8x8xf32>
    %79 = tpu.matmul %78, %67, %cst_38 {dimension_numbers = #tpu.dot_dimension_numbers<[1], [0], [0], [1], [0, 0, 1, 1], [], []>} : vector<8x8xf32>, vector<8x8xf32>, vector<8x8xf32> -> vector<8x8xf32>
    %c24 = arith.constant 24 : index
    %c0_39 = arith.constant 0 : index
    %80 = vector.load %arg7[%c24, %c0_39] : memref<32x32xf32, #tpu.memory_space<vmem>>, vector<8x32xf32>
    %cst_40 = arith.constant dense<0.000000e+00> : vector<8x32xf32>
    %81 = tpu.matmul %79, %80, %cst_40 {dimension_numbers = #tpu.dot_dimension_numbers<[1], [0], [0], [1], [0, 0, 1, 1], [], []>} : vector<8x8xf32>, vector<8x32xf32>, vector<8x32xf32> -> vector<8x32xf32>
    %82 = arith.addf %64, %81 : vector<8x32xf32>
    %c0_41 = arith.constant 0 : index
    %c0_42 = arith.constant 0 : index
    %83 = vector.load %arg8[%c0_41, %c0_42] : memref<1x32xf32, #tpu.memory_space<vmem>>, vector<1x32xf32>
    %84 = vector.broadcast %83 : vector<1x32xf32> to vector<8x32xf32>
    %85 = arith.addf %82, %84 : vector<8x32xf32>
    %c0_43 = arith.constant 0 : index
    %c0_44 = arith.constant 0 : index
    %c0_45 = arith.constant 0 : index
    %86 = vector.load %arg9[%c0_43, %c0_44, %c0_45] : memref<1x8x32xf32, #tpu.memory_space<vmem>>, vector<1x8x32xf32>
    %87 = vector.shape_cast %86 : vector<1x8x32xf32> to vector<8x32xf32>
    %88 = vector.shape_cast %85 : vector<8x32xf32> to vector<1x8x32xf32>
    tpu.vector_store %arg9[%c0_43, %c0_44, %c0_45], %88 {strides = array<i32>} : memref<1x8x32xf32, #tpu.memory_space<vmem>>, vector<1x8x32xf32>,
    return
  }
  func.func @transform_0(%arg0: i32) -> (i32, i32, i32) {
    %c0_i32 = arith.constant 0 : i32
    %c0_i32_0 = arith.constant 0 : i32
    %c0_i32_1 = arith.constant 0 : i32
    return %arg0, %c0_i32, %c0_i32_0 : i32, i32, i32
  }
  func.func @transform_1(%arg0: i32) -> (i32, i32, i32) {
    %c0_i32 = arith.constant 0 : i32
    %c0_i32_0 = arith.constant 0 : i32
    %c0_i32_1 = arith.constant 0 : i32
    return %arg0, %c0_i32, %c0_i32_0 : i32, i32, i32
  }
  func.func @transform_2(%arg0: i32) -> (i32, i32, i32) {
    %c0_i32 = arith.constant 0 : i32
    %c0_i32_0 = arith.constant 0 : i32
    %c0_i32_1 = arith.constant 0 : i32
    return %arg0, %c0_i32, %c0_i32_0 : i32, i32, i32
  }
  func.func @transform_3(%arg0: i32) -> (i32, i32) {
    %c0_i32 = arith.constant 0 : i32
    %c0_i32_0 = arith.constant 0 : i32
    %c0_i32_1 = arith.constant 0 : i32
    return %c0_i32, %c0_i32_0 : i32, i32
  }
  func.func @transform_4(%arg0: i32) -> (i32, i32) {
    %c0_i32 = arith.constant 0 : i32
    %c0_i32_0 = arith.constant 0 : i32
    %c0_i32_1 = arith.constant 0 : i32
    return %c0_i32, %c0_i32_0 : i32, i32
  }
  func.func @transform_5(%arg0: i32) -> (i32, i32) {
    %c0_i32 = arith.constant 0 : i32
    %c0_i32_0 = arith.constant 0 : i32
    %c0_i32_1 = arith.constant 0 : i32
    return %c0_i32, %c0_i32_0 : i32, i32
  }
  func.func @transform_6(%arg0: i32) -> (i32, i32) {
    %c0_i32 = arith.constant 0 : i32
    %c0_i32_0 = arith.constant 0 : i32
    %c0_i32_1 = arith.constant 0 : i32
    return %c0_i32, %c0_i32_0 : i32, i32
  }
  func.func @transform_7(%arg0: i32) -> (i32, i32) {
    %c0_i32 = arith.constant 0 : i32
    %c0_i32_0 = arith.constant 0 : i32
    %c0_i32_1 = arith.constant 0 : i32
    return %c0_i32, %c0_i32_0 : i32, i32
  }
  func.func @transform_8(%arg0: i32) -> (i32, i32, i32) {
    %c0_i32 = arith.constant 0 : i32
    %c0_i32_0 = arith.constant 0 : i32
    %c0_i32_1 = arith.constant 0 : i32
    return %arg0, %c0_i32, %c0_i32_0 : i32, i32, i32
  }
}

</mosaic_0001>

<bundles_post_ra>
// kernel: tpu_custom_call.1
= control target key start
LH: loop header
LB: loop body
LE: loop exit
PB: predicated region body
PF: predicated region fallthrough
CT: control target
= control target key end

     0   :  { %s2929_s0 = inlined_call_operand.hbm [shape: f32[2,8,32], index: 0, kind: input, shape index: {}]   ;;  %s2930_s1 = inlined_call_operand.hbm [shape: f32[2,8,32], index: 1, kind: input, shape index: {}]   ;;  %s2931_s2 = inlined_call_operand.hbm [shape: f32[2,8,32], index: 2, kind: input, shape index: {}]   ;;  %s2932_s3 = inlined_call_operand.hbm [shape: f32[32,32], index: 3, kind: input, shape index: {}]   ;;  %s2933_s4 = inlined_call_operand.hbm [shape: f32[32,32], index: 4, kind: input, shape index: {}]   ;;  %s2934_s5 = inlined_call_operand.hbm [shape: f32[32,32], index: 5, kind: input, shape index: {}]   ;;  %s2935_s6 = inlined_call_operand.hbm [shape: f32[32,32], index: 6, kind: input, shape index: {}]   ;;  %s2936_s7 = inlined_call_operand.vmem [shape: f32[1,32], index: 7, kind: input, shape index: {}]   ;;  %s2937_s8 = inlined_call_operand.hbm [shape: f32[2,8,32], index: 8, kind: output, shape index: {}]  }
   0x1   :  { %2961 = sst [smem:[#allocation25_spill]] %s2930_s1 }
   0x2   :  { %2962 = sst [smem:[#allocation26_spill]] %s2932_s3 }
   0x3   :  { %2963 = sst [smem:[#allocation27_spill]] %s2934_s5 }
   0x4   :  { %2964 = sst [smem:[#allocation28_spill]] %s2936_s7 }
   0x5   :  { %2965 = sst [smem:[#allocation29_spill]] %s2937_s8 }
   0x6   :  { %13 = vsyncpa [#allocation3], 0 }
   0x7   :  { %15 = vsyncpa [#allocation3 + $0x1], 0 }
   0x8   :  { %16 = vsyncpa [#allocation6], 0 }
   0x9   :  { %18 = vsyncpa [#allocation6 + $0x1], 0 }
   0xa   :  { %19 = vsyncpa [#allocation9], 0 }
   0xb   :  { %20 = vsyncpa [#allocation12], 0 }
   0xc   :  { %21 = vsyncpa [#allocation4], 0 }
   0xd   :  { %23 = vsyncpa [#allocation4 + $0x1], 0  ;;  %s2474_s27 = smov 0   ;;  %s2476_s28 = smov 0  }
   0xe   :  { %s2478_s29 = smov 0   ;;  %s2480_s30 = smov 0  }
   0xf LB: > { %2966 = sst [smem:[#allocation20_spill]] %s2399_s27  ;;  %s2413_s9 = smov [#allocation8]   ;;  %s2411_s30 = sphi %s2480_s30, %s3004_s30   ;;  %s2407_s29 = sphi %s2478_s29, %s3008_s29   ;;  %s2403_s28 = sphi %s2476_s28, %s3007_s28   ;;  %s2399_s27 = sphi %s2474_s27, %s3006_s27  }
  0x10   : > { %2967 = sst [smem:[#allocation21_spill]] %s2411_s30  ;;  %s255_s10 = sshll.u32 %s2413_s9, 4  ;;  %s2500_s10 = int_to_ptr.vmem [resolvable:$true] %s255_s10 }
  0x11   : > { %s2495_s11 = sadd.s32 4294967295, %s2411_s30   ;;  %p1815_p0 = scmp.ge.s32.totalorder %s2411_s30, 1 }
  0x12   : > { %p2948_p1 = scmp.eq.s32.totalorder %s2495_s11, 0  ;;  %p243_p2 = scmp.lt.s32.totalorder %s2411_s30, 3 }
  0x13   : > { %s2414_s13 = smov [#allocation11]   ;;  %s2970_s3 = sld [smem:[#allocation26_spill]] }
  0x14   : > { %p2502_p3 = pnand %p1815_p0, %p243_p2  ;;  %s281_s14 = sshll.u32 %s2414_s13, 4  ;;  %s2515_s14 = int_to_ptr.vmem [resolvable:$true] %s281_s14 }
  0x16   : > { %s2968_s12 = scalar_select %p2502_p3, 1, 0 }
  0x17   : > { %p2034_p5 = pneg %p2502_p3 }
  0x19   : > { %p2511_p6 = pnand %p2034_p5, %p2948_p1  ;;  %s2131_s18 = scalar_lea.hbm %s2970_s3, 512 }
  0x1a   : > { %p2132_p7 = scmp.ne.s32.totalorder %s2970_s3, %s2131_s18  ;;  %p2138_p11 = scmp.lt.u32.totalorder %s2131_s18, %s2970_s3 }
  0x1b   : > { %s2969_s15 = scalar_select %p2511_p6, 1, 0 }
  0x1c   : > { %p2525_p8 = pneg %p2511_p6 }
  0x1e   : > { %s2971_s21 = scalar_select %p2525_p8, 1, 0 }
  0x1f   : > { %p2134_p9 = pnand %p2525_p8, %p2132_p7 }
  0x21   : > { %p2135_p10 = pneg %p2134_p9 }
  0x23   : > { %p2140_p12 = pnand %p2138_p11, %p2135_p10 }
  0x25   : > { %2143 = shalt.err (!%p2140_p12)
}
  0x26   : > { %s2144_s24 = scalar_lea.vmem %s2500_s10, 512  ;;  %p2152_p5 = scmp.lt.s32.totalorder %s2500_s10, %s2500_s10 }
  0x27   : > { %p2145_p13 = scmp.ne.s32.totalorder %s2500_s10, %s2144_s24  ;;  %p2153_p4 = scmp.lt.s32.totalorder %s2144_s24, %s2144_s24 }
  0x29   : > { %p2147_p0 = pnand %p2145_p13, %p2525_p8  ;;  %p2154_p7 = por %p2153_p4, %p2152_p5 }
  0x2b   : > { %p2148_p2 = pneg %p2147_p0 }
  0x2d   : > { %p2155_p9 = pnand %p2154_p7, %p2148_p2 }
  0x2f   : > { %2158 = shalt.err (!%p2155_p9)
}
  0x30   : > { %s2939_s25 = smov 128   ;;  %s2942_s26 = smov 8  }
  0x31   : > { %2037 = dma.hbm_to_vmem [thread:$0]  (!%p2511_p6), %s2970_s3, 512, %s2500_s10, [#allocation9], %s2939_s25, %s2939_s25, %s2942_s26  }
  0x32   : > { %s2972_s5 = sld [smem:[#allocation27_spill]] }
  0x38   : > { %s2159_s18 = scalar_lea.hbm %s2972_s5, 512 }
  0x39   : > { %p2160_p4 = scmp.ne.s32.totalorder %s2972_s5, %s2159_s18  ;;  %p2166_p12 = scmp.lt.u32.totalorder %s2159_s18, %s2972_s5 }
  0x3b   : > { %p2162_p10 = pnand %p2160_p4, %p2525_p8 }
  0x3d   : > { %p2163_p11 = pneg %p2162_p10 }
  0x3f   : > { %p2168_p13 = pnand %p2166_p12, %p2163_p11 }
  0x41   : > { %2171 = shalt.err (!%p2168_p13)
}
  0x42   : > { %s2172_s10 = scalar_lea.vmem %s2515_s14, 512  ;;  %p2180_p7 = scmp.lt.s32.totalorder %s2515_s14, %s2515_s14 }
  0x43   : > { %p2173_p0 = scmp.ne.s32.totalorder %s2515_s14, %s2172_s10  ;;  %p2181_p9 = scmp.lt.s32.totalorder %s2172_s10, %s2172_s10 }
  0x45   : > { %p2175_p2 = pnand %p2173_p0, %p2525_p8  ;;  %p2182_p4 = por %p2181_p9, %p2180_p7 }
  0x47   : > { %p2176_p5 = pneg %p2175_p2 }
  0x49   : > { %p2183_p10 = pnand %p2182_p4, %p2176_p5 }
  0x4b   : > { %2186 = shalt.err (!%p2183_p10)
}
  0x4c   : > { %2043 = dma.hbm_to_vmem [thread:$0]  (!%p2511_p6), %s2972_s5, 512, %s2515_s14, [#allocation12], %s2939_s25, %s2939_s25, %s2942_s26  }
  0x4d   : > { %s1814_s13 = sadd.s32 4294967294, %s2411_s30   ;;  %s2577_s16 = sadd.s32 1, %s2411_s30  }
  0x4e   : > { %2973 = sst [smem:[#allocation22_spill]] %s2577_s16  ;;  %s33_s17 = ssub.s32 %s2411_s30, %s2577_s16 }
  0x4f   : > { %s36_s18 = sadd.s32 1, %s2407_s29  ;;  %p34_p11 = scmp.eq.s32.totalorder %s33_s17, 0 }
  0x50   : > { %p43_p12 = scmp.ne.s32.totalorder %s2407_s29, %s2403_s28  ;;  %p44_p13 = scmp.eq.s32.totalorder %s2411_s30, 0 }
  0x51   : > { %p49_p0 = scmp.ne.s32.totalorder %s2403_s28, %s2399_s27  ;;  %p230_p7 = scmp.eq.s32.totalorder %s2495_s11, 1 }
  0x52   : > { %s2588_s19 = scalar_select %p34_p11, %s2407_s29, %s36_s18  }
  0x53   : > { %p45_p2 = por %p44_p13, %p43_p12  ;;  %p2592_p5 = por %p2948_p1, %p49_p0 }
  0x54   : > { %2974 = sst [smem:[#allocation23_spill]] %s2588_s19  ;;  %p236_p9 = scmp.eq.s32.totalorder %s1814_s13, 1 }
  0x55   : > { %s2975_s20 = scalar_select %p2592_p5, 1, 0 }
  0x56   : > { %p2065_p4 = scmp.lt.s32.totalorder %s2411_s30, 2  ;;  %s2941_s14 = sand.u32 1, %s2407_s29  }
  0x57   : > { %p2599_p10 = por %p230_p7, %p43_p12  ;;  %p2603_p3 = por %p236_p9, %p49_p0 }
  0x58   : > { %s2609_s10 = sshll.u32 %s2941_s14, 3  ;;  %s2612_s24 = sshll.u32 %s2411_s30, 7 }
  0x59   : > { %s2976_s22 = scalar_select %p2599_p10, 1, 0 }
  0x5a   : > { %s2977_s23 = scalar_select %p2603_p3, 1, 0 }
  0x5b   : > { %p2614_p11 = pnand %p2065_p4, %p45_p2  ;;  %s329_s13 = sand.u32 1, %s2411_s30  }
  0x5c   : > { %2978 = sst [smem:[#allocation24_spill]] %s2977_s23  ;;  %s2980_s1 = sld [smem:[#allocation25_spill]] }
  0x5d   : > { %s2979_s9 = scalar_select %p2614_p11, 1, 0 }
  0x5e   : > { %s333_s14 = scalar_lea.vmem [#allocation5], %s2609_s10  ;;  %s2417_s3 = smov [#allocation10]  }
  0x5f   : > { %s340_s26 = sshll.u32 %s333_s14, 4  ;;  %s2628_s5 = sshll.u32 %s2417_s3, 4  ;;  %s2626_s26 = int_to_ptr.vmem [resolvable:$true] %s340_s26  ;;  %s269_s5 = int_to_ptr.vmem [resolvable:$true] %s2628_s5 }
  0x60   : > { %s2630_s19 = scalar_lea.sflag [#allocation6], %s329_s13  ;;  %p2636_p13 = pneg %p2614_p11 }
  0x62   : > { %s2623_s25 = scalar_lea.hbm %s2980_s1, %s2612_s24  ;;  %s2192_s30 = scalar_lea.hbm %s2980_s1, 256 }
  0x63   : > { %s2187_s16 = scalar_lea.hbm %s2623_s25, 128  ;;  %p2193_p7 = scmp.lt.u32.totalorder %s2623_s25, %s2980_s1 }
  0x64   : > { %p2188_p12 = scmp.ne.s32.totalorder %s2623_s25, %s2187_s16  ;;  %p2194_p9 = scmp.lt.u32.totalorder %s2192_s30, %s2187_s16 }
  0x65   : > { %s2981_s17 = scalar_select %p2636_p13, 1, 0 }
  0x66   : > { %p2190_p0 = pnand %p2636_p13, %p2188_p12  ;;  %p2195_p4 = por %p2194_p9, %p2193_p7 }
  0x67   : > { %p2196_p1 = scmp.lt.u32.totalorder %s2187_s16, %s2623_s25 }
  0x68   : > { %p2191_p2 = pneg %p2190_p0 }
  0x69   : > { %p2197_p3 = por %p2196_p1, %p2195_p4 }
  0x6b   : > { %p2198_p10 = pnand %p2197_p3, %p2191_p2 }
  0x6d   : > { %2201 = shalt.err (!%p2198_p10)
}
  0x6e   : > { %s2202_s13 = scalar_lea.vmem %s2626_s26, 128  ;;  %s2418_s18 = smov [#allocation5]  }
  0x6f   : > { %p2203_p12 = scmp.ne.s32.totalorder %s2626_s26, %s2202_s13  ;;  %s2207_s14 = sshll.u32 %s2418_s18, 4  ;;  %s2208_s14 = int_to_ptr.vmem [resolvable:$false] %s2207_s14 }
  0x70   : > { %s2209_s23 = scalar_lea.vmem %s2208_s14, 256  ;;  %p2210_p6 = scmp.lt.s32.totalorder %s2626_s26, %s2208_s14 }
  0x71   : > { %p2205_p0 = pnand %p2203_p12, %p2636_p13  ;;  %p2211_p8 = scmp.lt.s32.totalorder %s2209_s23, %s2202_s13 }
  0x73   : > { %p2206_p5 = pneg %p2205_p0  ;;  %p2212_p7 = por %p2211_p8, %p2210_p6 }
  0x75   : > { %p2213_p9 = pnand %p2212_p7, %p2206_p5 }
  0x77   : > { %2216 = shalt.err (!%p2213_p9)
}
  0x78   : > { %2053 = dma.hbm_to_vmem [thread:$0]  (!%p2614_p11), %s2623_s25, 128, %s2626_s26, %s2630_s19  }
  0x79   : > { %s2217_s3 = scalar_lea.hbm %s2933_s4, 512  ;;  %p2982_p3 = scmp.ne.s32.totalorder %s2971_s21, 0 }
  0x7a   : > { %p2218_p1 = scmp.ne.s32.totalorder %s2933_s4, %s2217_s3  ;;  %p2224_p5 = scmp.lt.u32.totalorder %s2217_s3, %s2933_s4 }
  0x7c   : > { %p2220_p6 = pnand %p2218_p1, %p2982_p3 }
  0x7e   : > { %p2221_p8 = pneg %p2220_p6 }
  0x80   : > { %p2226_p10 = pnand %p2224_p5, %p2221_p8 }
  0x82   : > { %2229 = shalt.err (!%p2226_p10)
}
  0x83   : > { %s2230_s23 = scalar_lea.vmem %s269_s5, 512  ;;  %p2238_p0 = scmp.lt.s32.totalorder %s269_s5, %s269_s5 }
  0x84   : > { %p2231_p2 = scmp.ne.s32.totalorder %s269_s5, %s2230_s23  ;;  %p2239_p7 = scmp.lt.s32.totalorder %s2230_s23, %s2230_s23 }
  0x86   : > { %p2233_p4 = pnand %p2231_p2, %p2982_p3  ;;  %p2240_p9 = por %p2239_p7, %p2238_p0 }
  0x88   : > { %p2234_p12 = pneg %p2233_p4 }
  0x8a   : > { %p2241_p11 = pnand %p2240_p9, %p2234_p12 }
  0x8c   : > { %2244 = shalt.err (!%p2241_p11)
}
  0x8d   : > { %p2983_p1 = scmp.ne.s32.totalorder %s2969_s15, 0  ;;  %s2984_s1 = smov 8  }
  0x8e   : > { %s2985_s25 = smov 128   ;;  %s2419_s16 = smov [#allocation13]  }
  0x8f   : > { %2040 = dma.hbm_to_vmem [thread:$0]  (!%p2983_p1), %s2933_s4, 512, %s269_s5, [#allocation9], %s2985_s25, %s2985_s25, %s2984_s1  }
  0x90   : > { %s294_s3 = sshll.u32 %s2419_s16, 4  ;;  %s2245_s14 = scalar_lea.hbm %s2935_s6, 512  ;;  %s295_s3 = int_to_ptr.vmem [resolvable:$true] %s294_s3 }
  0x91   : > { %p2246_p11 = scmp.ne.s32.totalorder %s2935_s6, %s2245_s14  ;;  %p2252_p5 = scmp.lt.u32.totalorder %s2245_s14, %s2935_s6 }
  0x93   : > { %p2248_p6 = pnand %p2246_p11, %p2982_p3 }
  0x95   : > { %p2249_p8 = pneg %p2248_p6 }
  0x97   : > { %p2254_p10 = pnand %p2252_p5, %p2249_p8 }
  0x99   : > { %2257 = shalt.err (!%p2254_p10)
}
  0x9a   : > { %s2258_s5 = scalar_lea.vmem %s295_s3, 512  ;;  %p2266_p0 = scmp.lt.s32.totalorder %s295_s3, %s295_s3 }
  0x9b   : > { %p2259_p2 = scmp.ne.s32.totalorder %s295_s3, %s2258_s5  ;;  %p2267_p7 = scmp.lt.s32.totalorder %s2258_s5, %s2258_s5 }
  0x9d   : > { %p2261_p4 = pnand %p2259_p2, %p2982_p3  ;;  %p2268_p9 = por %p2267_p7, %p2266_p0 }
  0x9f   : > { %p2262_p12 = pneg %p2261_p4 }
  0xa1   : > { %p2269_p13 = pnand %p2268_p9, %p2262_p12 }
  0xa3   : > { %2272 = shalt.err (!%p2269_p13)
}
  0xa4   : > { %2046 = dma.hbm_to_vmem [thread:$0]  (!%p2983_p1), %s2935_s6, 512, %s295_s3, [#allocation12], %s2985_s25, %s2985_s25, %s2984_s1  }
  0xa5   : > { %s2707_s26 = scalar_lea.hbm %s2929_s0, %s2612_s24  ;;  %s315_s15 = scalar_lea.vmem [#allocation2], %s2609_s10 }
  0xa6   : > { %s322_s30 = sshll.u32 %s315_s15, 4  ;;  %s2986_s16 = sand.u32 1, %s2407_s29   ;;  %s323_s30 = int_to_ptr.vmem [resolvable:$true] %s322_s30 }
  0xa7   : > { %s312_s18 = scalar_lea.sflag [#allocation3], %s2986_s16  ;;  %s2273_s13 = scalar_lea.hbm %s2707_s26, 128 }
  0xa8   : > { %p2274_p13 = scmp.ne.s32.totalorder %s2707_s26, %s2273_s13  ;;  %p2987_p3 = scmp.ne.s32.totalorder %s2981_s17, 0 }
  0xa9   : > { %s2278_s3 = scalar_lea.hbm %s2929_s0, 256  ;;  %p2279_p1 = scmp.lt.u32.totalorder %s2707_s26, %s2929_s0 }
  0xaa   : > { %p2276_p11 = pnand %p2274_p13, %p2987_p3  ;;  %p2280_p8 = scmp.lt.u32.totalorder %s2278_s3, %s2273_s13 }
  0xab   : > { %p2282_p10 = scmp.lt.u32.totalorder %s2273_s13, %s2707_s26 }
  0xac   : > { %p2277_p6 = pneg %p2276_p11  ;;  %p2281_p5 = por %p2280_p8, %p2279_p1 }
  0xae   : > { %p2283_p2 = por %p2282_p10, %p2281_p5 }
  0xb0   : > { %p2284_p4 = pnand %p2283_p2, %p2277_p6 }
  0xb2   : > { %2287 = shalt.err (!%p2284_p4)
}
  0xb3   : > { %s2288_s5 = scalar_lea.vmem %s323_s30, 128  ;;  %s2420_s7 = smov [#allocation2]  }
  0xb4   : > { %p2289_p12 = scmp.ne.s32.totalorder %s323_s30, %s2288_s5  ;;  %s2293_s8 = sshll.u32 %s2420_s7, 4  ;;  %s2294_s8 = int_to_ptr.vmem [resolvable:$false] %s2293_s8 }
  0xb5   : > { %s2295_s27 = scalar_lea.vmem %s2294_s8, 256  ;;  %p2296_p9 = scmp.lt.s32.totalorder %s323_s30, %s2294_s8 }
  0xb6   : > { %p2291_p0 = pnand %p2289_p12, %p2987_p3  ;;  %p2297_p13 = scmp.lt.s32.totalorder %s2295_s27, %s2288_s5 }
  0xb8   : > { %p2292_p7 = pneg %p2291_p0  ;;  %p2298_p11 = por %p2297_p13, %p2296_p9 }
  0xba   : > { %p2299_p1 = pnand %p2298_p11, %p2292_p7 }
  0xbc   : > { %2302 = shalt.err (!%p2299_p1)
}
  0xbd   : > { %p2988_p8 = scmp.ne.s32.totalorder %s2979_s9, 0  ;;  %s2733_s16 = scalar_lea.hbm %s2931_s2, %s2612_s24 }
  0xbe   : > { %s351_s13 = scalar_lea.vmem [#allocation7], %s2609_s10  ;;  %s2303_s25 = scalar_lea.hbm %s2733_s16, 128 }
  0xbf   : > { %2050 = dma.hbm_to_vmem [thread:$0]  (!%p2988_p8), %s2707_s26, 128, %s323_s30, %s312_s18  }
  0xc0   : > { %s358_s1 = sshll.u32 %s351_s13, 4  ;;  %p2304_p6 = scmp.ne.s32.totalorder %s2733_s16, %s2303_s25  ;;  %s359_s1 = int_to_ptr.vmem [resolvable:$true] %s358_s1 }
  0xc1   : > { %s2308_s26 = scalar_lea.hbm %s2931_s2, 256  ;;  %p2309_p2 = scmp.lt.u32.totalorder %s2733_s16, %s2931_s2 }
  0xc2   : > { %p2306_p5 = pnand %p2304_p6, %p2987_p3  ;;  %p2310_p4 = scmp.lt.u32.totalorder %s2308_s26, %s2303_s25 }
  0xc3   : > { %p2312_p0 = scmp.lt.u32.totalorder %s2303_s25, %s2733_s16 }
  0xc4   : > { %p2307_p10 = pneg %p2306_p5  ;;  %p2311_p12 = por %p2310_p4, %p2309_p2 }
  0xc6   : > { %p2313_p7 = por %p2312_p0, %p2311_p12 }
  0xc8   : > { %p2314_p9 = pnand %p2313_p7, %p2307_p10 }
  0xca   : > { %2317 = shalt.err (!%p2314_p9)
}
  0xcb   : > { %s2318_s10 = scalar_lea.vmem %s359_s1, 128  ;;  %s2421_s24 = smov [#allocation7]  }
  0xcc   : > { %p2319_p13 = scmp.ne.s32.totalorder %s359_s1, %s2318_s10  ;;  %s2323_s23 = sshll.u32 %s2421_s24, 4  ;;  %s2324_s23 = int_to_ptr.vmem [resolvable:$false] %s2323_s23 }
  0xcd   : > { %s2325_s5 = scalar_lea.vmem %s2324_s23, 256  ;;  %p2326_p6 = scmp.lt.s32.totalorder %s359_s1, %s2324_s23 }
  0xce   : > { %p2321_p11 = pnand %p2319_p13, %p2987_p3  ;;  %p2327_p5 = scmp.lt.s32.totalorder %s2325_s5, %s2318_s10 }
  0xd0   : > { %p2322_p1 = pneg %p2321_p11  ;;  %p2328_p8 = por %p2327_p5, %p2326_p6 }
  0xd2   : > { %p2329_p2 = pnand %p2328_p8, %p2322_p1 }
  0xd4   : > { %2332 = shalt.err (!%p2329_p2)
}
  0xd5   : > { %p2989_p4 = scmp.ne.s32.totalorder %s2979_s9, 0  ;;  %p2990_p10 = scmp.ne.s32.totalorder %s2968_s12, 0 }
  0xd6   : > { %s2757_s17 = sand.u32 (!%p2990_p10), 1, %s2403_s28   ;;  %p2991_p3 = scmp.ne.s32.totalorder (!%p2990_p10), %s2975_s20, 0 }
  0xd7   : > { %2056 = dma.hbm_to_vmem [thread:$0]  (!%p2989_p4), %s2733_s16, 128, %s359_s1, %s2630_s19  }
  0xd8   : > { %367 = sbr.rel (%p2990_p10) target bundleno = 2814 (0xafe), region = 52  ;;  %s2760_s7 = sshll.u32 (!%p2990_p10), %s2757_s17, 3 }
  0xd9   : > { %s370_s8 = scalar_lea.sflag (!%p2990_p10), [#allocation3], %s2757_s17  ;;  %s373_s27 = scalar_lea.vmem (!%p2990_p10), [#allocation2], %s2760_s7 }
  0xdf   : > { %2378 = dma.done.wait (%p2991_p3), %s370_s8, 128  }
  0xe0   : > { %2380 = vsyncadd (%p2991_p3), %s370_s8, 4294967168  ;;  %s378_s12 = sand.u32 1, %s2495_s11   ;;  %s382_s9 = scalar_lea.vmem [#allocation5], %s2760_s7 }
  0xe1   : > { %s379_s19 = scalar_lea.sflag [#allocation6], %s378_s12 }
  0xe2   : > { %2382 = dma.done.wait (%p2991_p3), %s379_s19, 256  }
  0xe3   : > { %2384 = vsyncadd (%p2991_p3), %s379_s19, 4294967040  ;;  %s391_s21 = scalar_lea.vmem [#allocation7], %s2760_s7  ;;  %p2992_p8 = scmp.eq.s32.totalorder %s2495_s11, 0 }
  0xe5   : > { %2386 = dma.done.wait (%p2992_p8), [#allocation9], 1024   ;;  %p2993_p12 = pmov %p2992_p8 }
  0xe6   : > { %p2994_p0 = pmov %p2992_p8 }
  0xe7   : > { %2388 = vsyncadd (%p2993_p12), [#allocation9], 4294966272 }
  0xe8   : > { %2390 = dma.done.wait (%p2994_p0), [#allocation12], 1024   ;;  %p2995_p7 = pmov %p2994_p0 }
  0xe9   : > { %v2422_v0 = vmov 0.0|0.0   ;;  %vm2423_vm0 = vmmov 0   ;;  %v2424_v1 = vmov 0.0   ;;  %v531_v2 = vld [vmem:[#allocation10] sm:$0xff]  ;;  %v532_v3 = vld [vmem:[#allocation10 + $0x8] sm:$0xff]  ;;  %v533_v7 = vld [vmem:[#allocation10 + $0x10] sm:$0xff] }
  0xea   : > { %2392 = vsyncadd (%p2995_p7), [#allocation12], 4294966272  ;;  %1998 = vmatprep.subr.bf16.mxu1 %v2422_v0  ;;  %1992 = vmatprep.subr.bf16.mxu0 %v2422_v0  ;;  %v453_v4 = vld [vmem:[#allocation8] sm:$0xff]  ;;  %v1999_v5 = vpack.c.bf16 %v532_v3, %v531_v2  ;;  %v454_v6 = vld [vmem:[#allocation8 + $0x8] sm:$0xff]  ;;  %vm457_vm1 = vcmask 261120   ;;  %vm685_vm2 = vcmask 64512  }
  0xeb   : > { %1918 = vmatprep.mubr.msk.f32.mxu1 %vm2423_vm0, %v2424_v1  ;;  %1907 = vmatprep.mubr.msk.f32.mxu0 %vm2423_vm0, %v2424_v1  ;;  %v534_v8 = vld [vmem:[#allocation10 + $0x18] sm:$0xff]  ;;  %v1993_v9 = vpack.c.bf16 %v454_v6, %v453_v4  ;;  %v455_v10 = vld [vmem:[#allocation8 + $0x10] sm:$0xff]  ;;  %v451_v14 = vld [vmem:[%s382_s9] sm:$0xff]  ;;  %s2425_s20 = smov 120   ;;  %s2426_s15 = smov 112  }
  0xec   : > { %v456_v11 = vld [vmem:[#allocation8 + $0x18] sm:$0xff]  ;;  %2000 = vmatpush3.bf16.msra.mxu1 %v1999_v5  ;;  %v2002_v12 = vpack.c.bf16 %v534_v8, %v533_v7  ;;  %v608_v16 = vld [vmem:[#allocation11] sm:$0xff]  ;;  %v609_v17 = vld [vmem:[#allocation11 + $0x8] sm:$0xff]  ;;  %s2427_s16 = smov 104   ;;  %s2996_s25 = sld [smem:[#allocation28_spill]] }
  0xed   : > { %1994 = vmatpush3.bf16.msra.mxu0 %v1993_v9  ;;  %2001 = vmatprep.subr.bf16.mxu1 %v2422_v0  ;;  %v1996_v13 = vpack.c.bf16 %v456_v11, %v455_v10  ;;  %v450_v15 = vld [vmem:[%s373_s27] sm:$0xff]  ;;  %v2005_v19 = vpack.c.bf16 %v609_v17, %v608_v16  ;;  %v1013_v50 = vld [vmem:[#allocation13 + $0x8] sm:$0xff]  ;;  %v846_v55 = vld [vmem:[#allocation13] sm:$0xff]  ;;  %s1857_s3 = sshll.u32 %s2495_s11, 7  ;;  %s449_s14 = scalar_lea.vmem [#allocation14], %s2760_s7 }
  0xee   : > { %1995 = vmatprep.subr.bf16.mxu0 %v2422_v0  ;;  %v610_v18 = vld [vmem:[#allocation11 + $0x10] sm:$0xff]  ;;  %v611_v20 = vld [vmem:[#allocation11 + $0x18] sm:$0xff]  ;;  %s1663_s26 = sshll.u32 %s449_s14, 4  ;;  %s2997_s10 = sld [smem:[#allocation29_spill]]  ;;  %s2886_s26 = int_to_ptr.vmem [resolvable:$true] %s1663_s26 }
  0xef   : > { %v2008_v21 = vpack.c.bf16 %v611_v20, %v610_v18  ;;  %v452_v22 = vld [vmem:[%s391_s21] sm:$0xff]  ;;  %s1650_s23 = scalar_lea.sflag [#allocation4], %s2757_s17  ;;  %s2333_s5 = scalar_lea.vmem %s2886_s26, 128 }
  0xf0   : > { %2003 = vmatpush3.bf16.msra.mxu1 %v2002_v12  ;;  %v1325_v18 = vld [vmem:[#allocation13 + $0x10] sm:$0xff]  ;;  %p2334_p9 = scmp.ne.s32.totalorder %s2886_s26, %s2333_s5  ;;  %p2998_p13 = scmp.ne.s32.totalorder %s2976_s22, 0 }
  0xf1   : > { %1997 = vmatpush3.bf16.msra.mxu0 %v1996_v13  ;;  %1932 = vmatprep.subr.mxu1 %v2424_v1  ;;  %s2428_s11 = smov [#allocation14]  }
  0xf2   : > { %2004 = vmatprep.subr.bf16.mxu0 %v2422_v0  ;;  %p2335_p11 = pnand %p2334_p9, %p2998_p13  ;;  %s2337_s7 = sshll.u32 %s2428_s11, 4  ;;  %s2338_s7 = int_to_ptr.vmem [resolvable:$false] %s2337_s7 }
  0xf3   : > { %1919 = vmatmul.mubr.msk.f32.vlgmr.msra.gmra.mrb[0].mxu1 %vm457_vm1, %v451_v14  ;;  %s2339_s8 = scalar_lea.vmem %s2338_s7, 256  ;;  %p2340_p6 = scmp.lt.s32.totalorder %s2886_s26, %s2338_s7 }
  0xf4   : > { %1908 = vmatmul.mubr.msk.f32.vlgmr.msra.gmra.mrb[0].mxu0 %vm457_vm1, %v450_v15  ;;  %1934 = vmatprep.mubr.msk.f32.mxu1 %vm2423_vm0, %v2424_v1  ;;  %s2884_s24 = scalar_lea.hbm %s2997_s10, %s1857_s3  ;;  %p2336_p1 = pneg %p2335_p11 }
  0xf5   : > { %1929 = vmatprep.mubr.msk.f32.mxu0 %vm2423_vm0, %v2424_v1  ;;  %2006 = vmatpush3.bf16.msra.mxu0 %v2005_v19  ;;  %p2341_p5 = scmp.lt.s32.totalorder %s2339_s8, %s2333_s5 }
  0xf6   : > { %2007 = vmatprep.subr.bf16.mxu0 %v2422_v0 }
  0xf7   : > { %p2342_p2 = por %p2341_p5, %p2340_p6 }
  0xf9   : > { %2009 = vmatpush3.bf16.msra.mxu0 %v2008_v21  ;;  %p2343_p4 = pnand %p2342_p2, %p2336_p1 }
  0xfa   : > { %1942 = vmatprep.subr.mxu0 %v2424_v1 }
  0xfc   : > { %1930 = vmatmul.mubr.msk.f32.vlgmr.msra.gmra.mrb[2].mxu0 %vm457_vm1, %v452_v22 }
  0xfd   : > { %1944 = vmatprep.mubr.msk.f32.mxu0 %vm2423_vm0, %v2424_v1 }
 0x1c6   : > { %v604_v23 = vpop.f32.mrb[0].mxu1 }
 0x1c7   : > { %849 = vrot.lane.b32.xlu0 %v604_v23, %s2425_s20  ;;  %v1920_v24 = vpop.f32.mrb[1].mxu1  ;;  %1933 = vmatpush3.xpose.msk.msra.mxu1 %vm685_vm2, %v604_v23  ;;  %v2806_v25 = vpop.f32.mrb[0].mxu0 }
 0x1c8   : > { %v1909_v26 = vpop.f32.mrb[1].mxu0  ;;  %1937 = vmatprep.subr.mxu1 %v2424_v1 }
 0x1ca   : > { %1935 = vmatmul.mubr.msk.f32.vlgmr.msra.gmra.mrb[2].mxu1 %vm685_vm2, %v2806_v25 }
 0x1cb   : > { %847 = vrot.lane.b32.xlu0 %v2806_v25, %s2425_s20  ;;  %1939 = vmatprep.mubr.msk.f32.mxu1 %vm2423_vm0, %v2424_v1 }
 0x1cf   : > { %v2820_v29 = vpop.f32.mrb[2].mxu0 }
 0x1d0   : > { %v1931_v30 = vpop.f32.mrb[3].mxu0  ;;  %1938 = vmatpush3.msra.mxu1 %v2820_v29 }
 0x1d1   : > { %1947 = vmatprep.subr.mxu1 %v2424_v1  ;;  %v1565_v30 = vld [vmem:[#allocation13 + $0x18] sm:$0xff] }
 0x239   : > { %v850_v27 = vpop.permute.xlu0 %849 }
 0x23a   : > { %1943 = vmatpush3.xpose.msk.msra.mxu0 %vm685_vm2, %v850_v27 }
 0x23b   : > { %1952 = vmatprep.subr.mxu0 %v2424_v1 }
 0x23d   : > { %v848_v28 = vpop.permute.xlu0 %847 }
 0x23e   : > { %1945 = vmatmul.mubr.msk.f32.vlgmr.msra.gmra.mrb[4].mxu0 %vm685_vm2, %v848_v28 }
 0x23f   : > { %1954 = vmatprep.mubr.msk.f32.mxu0 %vm2423_vm0, %v2424_v1  ;;  %1953 = vmatpush3.msra.mxu0 %v1013_v50 }
 0x240   : > { %1962 = vmatprep.subr.mxu0 %v2424_v1 }
 0x29d   : > { %v758_v31 = vpop.f32.mrb[2].mxu1 }
 0x29e   : > { %v1936_v32 = vpop.f32.mrb[3].mxu1  ;;  %v762_v33 = vsel %vm685_vm2, %v758_v31, -inf }
 0x29f   : > { %763 = vmax.xlane.f32.xlu1 %v762_v33 }
 0x311   : > { %v921_v34 = vpop.f32.mrb[4].mxu0 }
 0x312   : > { %v1946_v35 = vpop.f32.mrb[5].mxu0  ;;  %v925_v36 = vsel %vm685_vm2, %v921_v34, -inf }
 0x313   : > { %926 = vmax.xlane.f32.xlu1 %v925_v36 }
 0x32c   : > { %v764_v37 = vpop.xlane.xlu1 %763 }
 0x32d   : > { %v765_v38 = vsub.f32 %v758_v31, %v764_v37 }
 0x32f   : > { %v766_v39 = vmul.f32 1.442695, %v765_v38 }
 0x331   : > { %2115 = vpow2.f32 %v766_v39  ;;  %v1855_v39 = vld [vmem:[%s2996_s25] ss:$0 sm:$0xff] }
 0x33b   : > { %v2116_v40 = vpop.eup %2115 }
 0x33c   : > { %v768_v41 = vsel %vm685_vm2, %v2116_v40, 0.0 }
 0x33d   : > { %769 = vadd.xlane.f32.xlu0 %v768_v41 }
 0x353   : > { %1249 = vrot.lane.b32.xlu0 %v2820_v29, %s2426_s15 }
 0x357   : > { %1402 = vrot.lane.b32.xlu0 %v604_v23, %s2427_s16 }
 0x3a0   : > { %v927_v42 = vpop.xlane.xlu1 %926 }
 0x3a1   : > { %v928_v43 = vsub.f32 %v921_v34, %v927_v42 }
 0x3a3   : > { %v929_v44 = vmul.f32 1.442695, %v928_v43 }
 0x3a5   : > { %2117 = vpow2.f32 %v929_v44 }
 0x3af   : > { %v2118_v45 = vpop.eup %2117 }
 0x3b0   : > { %v931_v46 = vsel %vm685_vm2, %v2118_v45, 0.0 }
 0x3b1   : > { %932 = vadd.xlane.f32.xlu1 %v931_v46 }
 0x3c2   : > { %937 = vrot.lane.b32.xlu1 %v2820_v29, %s2425_s20 }
 0x3c6   : > { %1162 = vrot.lane.b32.xlu1 %v604_v23, %s2426_s15 }
 0x3ca   : > { %v770_v47 = vpop.xlane.xlu0 %769  ;;  %1160 = vrot.lane.b32.xlu1 %v2806_v25, %s2426_s15 }
 0x3cb   : > { %2119 = vrcp.f32 %v770_v47 }
 0x3ce   : > { %v1250_v57 = vpop.permute.xlu0 %1249 }
 0x3d2   : > { %v1403_v13 = vpop.permute.xlu0 %1402 }
 0x3d5   : > { %v2120_v48 = vpop.eup %2119 }
 0x3d6   : > { %v772_v49 = vmul.f32 %v2120_v48, %v2116_v40 }
 0x3d8   : > { %1940 = vmatmul.mubr.msk.f32.vlgmr.msra.gmra.mrb[4].mxu1 %vm685_vm2, %v772_v49 }
 0x3d9   : > { %1949 = vmatprep.mubr.msk.f32.mxu1 %vm2423_vm0, %v2424_v1 }
 0x43e   : > { %v933_v51 = vpop.xlane.xlu1 %932 }
 0x43f   : > { %2121 = vrcp.f32 %v933_v51 }
 0x442   : > { %v938_v52 = vpop.permute.xlu1 %937 }
 0x443   : > { %1948 = vmatpush3.msra.mxu1 %v938_v52 }
 0x444   : > { %1957 = vmatprep.subr.mxu1 %v2424_v1 }
 0x446   : > { %v1163_v59 = vpop.permute.xlu1 %1162 }
 0x449   : > { %v2122_v53 = vpop.eup %2121 }
 0x44a   : > { %v935_v54 = vmul.f32 %v2122_v53, %v2118_v45  ;;  %v1161_v62 = vpop.permute.xlu1 %1160 }
 0x44c   : > { %1950 = vmatmul.mubr.msk.f32.vlgmr.msra.gmra.mrb[6].mxu1 %vm685_vm2, %v935_v54 }
 0x44d   : > { %1958 = vmatpush3.msra.mxu1 %v846_v55  ;;  %1959 = vmatprep.mubr.msk.f32.mxu1 %vm2423_vm0, %v2424_v1 }
 0x44e   : > { %1967 = vmatprep.subr.mxu1 %v2424_v1 }
 0x4ab   : > { %v842_v56 = vpop.f32.mrb[4].mxu1 }
 0x4ac   : > { %v1941_v58 = vpop.f32.mrb[5].mxu1  ;;  %1960 = vmatmul.mubr.msk.f32.vlgmr.msra.gmra.mrb[8].mxu1 %vm685_vm2, %v842_v56 }
 0x4ad   : > { %1968 = vmatpush3.msra.mxu1 %v1250_v57  ;;  %1969 = vmatprep.mubr.msk.f32.mxu1 %vm2423_vm0, %v2424_v1 }
 0x4ae   : > { %1977 = vmatprep.subr.mxu1 %v2424_v1 }
 0x51f   : > { %v1009_v60 = vpop.f32.mrb[6].mxu1 }
 0x520   : > { %v1951_v61 = vpop.f32.mrb[7].mxu1  ;;  %1955 = vmatmul.mubr.msk.f32.vlgmr.msra.gmra.mrb[6].mxu0 %vm685_vm2, %v1009_v60 }
 0x521   : > { %1963 = vmatpush3.xpose.msk.msra.mxu0 %vm685_vm2, %v1163_v59  ;;  %1964 = vmatprep.mubr.msk.f32.mxu0 %vm2423_vm0, %v2424_v1 }
 0x522   : > { %1972 = vmatprep.subr.mxu0 %v2424_v1 }
 0x524   : > { %1965 = vmatmul.mubr.msk.f32.vlgmr.msra.gmra.mrb[8].mxu0 %vm685_vm2, %v1161_v62 }
 0x525   : > { %1974 = vmatprep.mubr.msk.f32.mxu0 %vm2423_vm0, %v2424_v1  ;;  %1973 = vmatpush3.msra.mxu0 %v1325_v18 }
 0x526   : > { %1982 = vmatprep.subr.mxu0 %v2424_v1 }
 0x57f   : > { %v1156_v63 = vpop.f32.mrb[8].mxu1 }
 0x580   : > { %v1961_v0 = vpop.f32.mrb[9].mxu1 }
 0x5f3   : > { %v1083_v2 = vpop.f32.mrb[6].mxu0 }
 0x5f4   : > { %v1157_v3 = vadd.f32 %v1156_v63, %v1083_v2  ;;  %v1956_v4 = vpop.f32.mrb[7].mxu0 }
 0x5f7   : > { %v1234_v5 = vpop.f32.mrb[8].mxu0 }
 0x5f8   : > { %v1966_v6 = vpop.f32.mrb[9].mxu0  ;;  %v1238_v7 = vsel %vm685_vm2, %v1234_v5, -inf }
 0x5f9   : > { %1239 = vmax.xlane.f32.xlu1 %v1238_v7 }
 0x686   : > { %v1240_v8 = vpop.xlane.xlu1 %1239 }
 0x687   : > { %v1241_v9 = vsub.f32 %v1234_v5, %v1240_v8 }
 0x689   : > { %v1242_v10 = vmul.f32 1.442695, %v1241_v9 }
 0x68b   : > { %2123 = vpow2.f32 %v1242_v10 }
 0x695   : > { %v2124_v11 = vpop.eup %2123 }
 0x696   : > { %v1244_v12 = vsel %vm685_vm2, %v2124_v11, 0.0 }
 0x697   : > { %1245 = vadd.xlane.f32.xlu0 %v1244_v12 }
 0x6ad   : > { %1400 = vrot.lane.b32.xlu0 %v2806_v25, %s2427_s16 }
 0x724   : > { %v1246_v14 = vpop.xlane.xlu0 %1245 }
 0x725   : > { %2125 = vrcp.f32 %v1246_v14 }
 0x728   : > { %v1401_v17 = vpop.permute.xlu0 %1400 }
 0x72f   : > { %v2126_v15 = vpop.eup %2125 }
 0x730   : > { %v1248_v16 = vmul.f32 %v2126_v15, %v2124_v11 }
 0x732   : > { %1970 = vmatmul.mubr.msk.f32.vlgmr.msra.gmra.mrb[10].mxu1 %vm685_vm2, %v1248_v16 }
 0x733   : > { %1978 = vmatpush3.xpose.msk.msra.mxu1 %vm685_vm2, %v1403_v13  ;;  %1979 = vmatprep.mubr.msk.f32.mxu1 %vm2423_vm0, %v2424_v1 }
 0x734   : > { %1987 = vmatprep.subr.mxu1 %v2424_v1 }
 0x736   : > { %1980 = vmatmul.mubr.msk.f32.vlgmr.msra.gmra.mrb[12].mxu1 %vm685_vm2, %v1401_v17 }
 0x737   : > { %1989 = vmatprep.mubr.msk.f32.mxu1 %vm2423_vm0, %v2424_v1  ;;  %1988 = vmatpush3.msra.mxu1 %v1565_v30 }
 0x805   : > { %v1321_v19 = vpop.f32.mrb[10].mxu1 }
 0x806   : > { %v1971_v20 = vpop.f32.mrb[11].mxu1  ;;  %1975 = vmatmul.mubr.msk.f32.vlgmr.msra.gmra.mrb[10].mxu0 %vm685_vm2, %v1321_v19 }
 0x807   : > { %1984 = vmatprep.mubr.msk.f32.mxu0 %vm2423_vm0, %v2424_v1 }
 0x809   : > { %v1474_v21 = vpop.f32.mrb[12].mxu1 }
 0x80a   : > { %v1981_v22 = vpop.f32.mrb[13].mxu1  ;;  %v1478_v23 = vsel %vm685_vm2, %v1474_v21, -inf }
 0x80b   : > { %1479 = vmax.xlane.f32.xlu0 %v1478_v23 }
 0x898   : > { %v1480_v24 = vpop.xlane.xlu0 %1479 }
 0x899   : > { %v1481_v25 = vsub.f32 %v1474_v21, %v1480_v24 }
 0x89b   : > { %v1482_v26 = vmul.f32 1.442695, %v1481_v25 }
 0x89d   : > { %2127 = vpow2.f32 %v1482_v26 }
 0x8a7   : > { %v2128_v27 = vpop.eup %2127 }
 0x8a8   : > { %v1484_v28 = vsel %vm685_vm2, %v2128_v27, 0.0 }
 0x8a9   : > { %1485 = vadd.xlane.f32.xlu1 %v1484_v28 }
 0x8ba   : > { %1489 = vrot.lane.b32.xlu1 %v2820_v29, %s2427_s16 }
 0x8d9   : > { %v1395_v1 = vpop.f32.mrb[10].mxu0 }
 0x8da   : > { %v1399_v31 = vadd.f32 %v1395_v1, %v1157_v3  ;;  %v1976_v32 = vpop.f32.mrb[11].mxu0 }
 0x936   : > { %v1486_v33 = vpop.xlane.xlu1 %1485 }
 0x937   : > { %2129 = vrcp.f32 %v1486_v33 }
 0x93a   : > { %v1490_v34 = vpop.permute.xlu1 %1489 }
 0x93b   : > { %1983 = vmatpush3.msra.mxu0 %v1490_v34 }
 0x941   : > { %v2130_v35 = vpop.eup %2129 }
 0x942   : > { %v1488_v36 = vmul.f32 %v2130_v35, %v2128_v27 }
 0x944   : > { %1985 = vmatmul.mubr.msk.f32.vlgmr.msra.gmra.mrb[12].mxu0 %vm685_vm2, %v1488_v36 }
 0xa17   : > { %v1561_v37 = vpop.f32.mrb[12].mxu0 }
 0xa18   : > { %v1986_v38 = vpop.f32.mrb[13].mxu0  ;;  %1990 = vmatmul.mubr.msk.f32.vlgmr.msra.gmra.mrb[14].mxu1 %vm685_vm2, %v1561_v37 }
 0xaeb   : > { %v1635_v29 = vpop.f32.mrb[14].mxu1 }
 0xaec   : > { %v1639_v40 = vadd.f32 %v1635_v29, %v1399_v31  ;;  %v1991_v41 = vpop.f32.mrb[15].mxu1 }
 0xaee   : > { %v1647_v42 = vadd.f32 %v1855_v39, %v1639_v40 }
 0xaf0   : > { %1648 = vst.msk [vmem:[%s449_s14] sm:$0xff] %vm457_vm1, %v1647_v42 }
 0xaf1   : > { %2346 = shalt.err (!%p2343_p4)
}
 0xaf2   : > { %s2347_s17 = scalar_lea.hbm %s2884_s24, 128  ;;  %s2351_s19 = scalar_lea.hbm %s2997_s10, 256 }
 0xaf3   : > { %p2348_p10 = scmp.ne.s32.totalorder %s2884_s24, %s2347_s17  ;;  %p2352_p12 = scmp.lt.u32.totalorder %s2884_s24, %s2997_s10 }
 0xaf4   : > { %p2353_p0 = scmp.lt.u32.totalorder %s2351_s19, %s2347_s17  ;;  %p2355_p9 = scmp.lt.u32.totalorder %s2347_s17, %s2884_s24 }
 0xaf5   : > { %p2349_p3 = pnand %p2348_p10, %p2998_p13 }
 0xaf6   : > { %p2354_p7 = por %p2353_p0, %p2352_p12 }
 0xaf7   : > { %p2350_p8 = pneg %p2349_p3 }
 0xaf8   : > { %p2356_p11 = por %p2355_p9, %p2354_p7 }
 0xafa   : > { %p2357_p1 = pnand %p2356_p11, %p2350_p8 }
 0xafc   : > { %2360 = shalt.err (!%p2357_p1)
}
 0xafd   : > { %2032 = dma.vmem_to_hbm [thread:$0]  (%p2998_p13), %s2886_s26, 128, %s2884_s24, %s1650_s23  }
 0xafe PF: > { %s2999_s20 = sld [smem:[#allocation20_spill]]  ;;  %s3000_s15 = sld [smem:[#allocation24_spill]] }
 0xaff   : > { %s3001_s16 = sld [smem:[#allocation21_spill]] }
 0xb04   : > { %s1675_s13 = sand.u32 1, %s2999_s20   ;;  %p3002_p6 = scmp.ne.s32.totalorder %s3000_s15, 0 }
 0xb05   : > { %p3003_p5 = scmp.ge.s32.totalorder %s3001_s16, 2  ;;  %s1676_s1 = scalar_lea.sflag [#allocation4], %s1675_s13 }
 0xb07   : > { %p2058_p2 = pnand %p3003_p5, %p3002_p6 }
 0xb09   : > { %2394 = dma.done.wait (!%p2058_p2), %s1676_s1, 128  }
 0xb0a   : > { %2396 = vsyncadd (!%p2058_p2), %s1676_s1, 4294967168  ;;  %s3004_s30 = sld [smem:[#allocation22_spill]]  ;;  %s3005_s25 = sld [smem:[#allocation23_spill]] }
 0xb0b   : > { %s3006_s27 = smov %s2403_s28  ;;  %s3007_s28 = smov %s2407_s29 }
 0xb10   : > { %p26_p4 = scmp.ge.s32.totalorder %s3004_s30, 4   ;;  %s3008_s29 = smov %s3005_s25 }
 0xb12   :  { %28 = sbr.rel (!%p26_p4) target bundleno = 15 (0xf), region = 137 }
 0xb19   :  { %1681 = vsyncpa [#allocation3], 1 }
 0xb1a   :  { %1683 = vsyncpa [#allocation3 + $0x1], 1 }
 0xb1b   :  { %1684 = vsyncpa [#allocation6], 1 }
 0xb1c   :  { %1686 = vsyncpa [#allocation6 + $0x1], 1 }
 0xb1d   :  { %1687 = vsyncpa [#allocation9], 1 }
 0xb1e   :  { %1688 = vsyncpa [#allocation12], 1 }
 0xb1f   :  { %1689 = vsyncpa [#allocation4], 1 }
 0xb20   :  { %1691 = vsyncpa [#allocation4 + $0x1], 1 }

</bundles_post_ra>
